<compile_context>
chip_gen: v7x
topology: tpu7x:2x2x1
jax: 0.10.0
libtpu: 0.0.40
codegen_flags: <defaults>
</compile_context>

<pallas_src>
import functools

import jax
import jax.numpy as jnp
from jax.experimental import pallas as pl
from jax.experimental.pallas import tpu as pltpu


def _rotary_kernel(x_ref, cos_ref, sin_ref, o_ref, *, lane_reps):
    # x_ref:   (bb, bt, HD)  input block (any float dtype)
    # cos_ref: (bt, W)       f32, cols 2k and 2k+1 both carry cos_k, replicated
    #                        over up to one vreg's worth of heads (W <= 128*k)
    # sin_ref: (bt, W)       f32, SIGN-BAKED: col 2k = -sin_k, col 2k+1 = +sin_k
    x = x_ref[...].astype(jnp.float32)
    cos = cos_ref[...]
    sin = sin_ref[...]
    if lane_reps > 1:
        # Broadcast the per-head table across the remaining heads in-lane.
        cos = jnp.tile(cos, (1, lane_reps))          # (bt, HD)
        sin = jnp.tile(sin, (1, lane_reps))
    cos = cos[None, :, :]
    sin = sin[None, :, :]

    hd = x.shape[-1]
    # Pairwise swap of interleaved (a, b) -> (b, a): two XLU lane-rotates plus
    # one parity select.  Wrapped lanes are never selected (lane 0 is even ->
    # takes x[j+1]; lane hd-1 is odd -> takes x[j-1]); head boundaries are safe
    # because every head starts on an even lane (D is even).
    left = pltpu.roll(x, shift=hd - 1, axis=2)       # left[..., j]  = x[..., j+1 mod hd]
    right = pltpu.roll(x, shift=1, axis=2)           # right[..., j] = x[..., j-1 mod hd]
    lane = jax.lax.broadcasted_iota(jnp.int32, (1, 1, hd), 2)
    x_swap = jnp.where((lane & 1) == 0, left, right)

    # out[2k]   = a*cos_k + b*(-sin_k)
    # out[2k+1] = b*cos_k + a*(+sin_k)
    o_ref[...] = (x * cos + x_swap * sin).astype(o_ref.dtype)


def make_rotation_tables(context_length: int, dim: int, freq: float):
    """Replicates RotaryPE._generate_positional_embeddings as cos / signed-sin tables."""
    if dim % 2 != 0:
        dim += 1
    power = 2.0 * jnp.arange(0, dim, 2, dtype=jnp.float32) / dim
    inv_freq = 1.0 / (freq ** power)                        # (dim/2,)
    m = jnp.arange(context_length, dtype=jnp.float32)       # (T_ctx,)
    angles = jnp.outer(m, inv_freq)                         # (T_ctx, dim/2)
    # interleave-expand: columns 2k and 2k+1 both carry angle k
    cos = jnp.repeat(jnp.cos(angles), 2, axis=-1)           # (T_ctx, dim)
    sin = jnp.repeat(jnp.sin(angles), 2, axis=-1)           # (T_ctx, dim)
    # bake alternating sign into sin: col 2k -> -sin_k, col 2k+1 -> +sin_k
    signs = jnp.tile(jnp.asarray([-1.0, 1.0], dtype=jnp.float32), dim // 2)
    return cos, sin * signs


def _head_replication(num_heads, head_dim):
    """How many heads of the table to replicate host-side (<= one 128-lane vreg)."""
    if head_dim >= 128:
        return 1
    rep = max(1, min(num_heads, 128 // head_dim))
    while num_heads % rep != 0:
        rep -= 1
    return rep


def _choose_blocks(B, T, HD, itemsize, sublane, target_bytes):
    def fit_bt(bb):
        if T <= sublane:
            return int(T)
        bt = target_bytes // max(1, bb * HD * itemsize)
        bt = min(int(bt), T)
        bt = max(sublane, (bt // sublane) * sublane)
        return int(bt)

    block_b = B
    block_t = fit_bt(block_b)
    # Split the batch when a full-B block overshoots the per-block budget
    # (keeps double-buffered blocks inside every generation's VMEM).
    while block_b > 1 and block_b * block_t * HD * itemsize > 2 * target_bytes:
        block_b = -(-block_b // 2)
        block_t = fit_bt(block_b)

    # Keep >= ~8 grid programs (>= 4 per v7x TensorCore) when T allows so the
    # pipeline has work to overlap and megacore has programs to shard.
    min_programs = 8
    b_blocks = -(-B // block_b)
    want_t_blocks = -(-min_programs // b_blocks)
    if T > sublane and want_t_blocks > 1:
        cap = -(-T // want_t_blocks)
        cap = max(sublane, (cap // sublane) * sublane)
        block_t = min(block_t, cap)
    return int(block_b), int(block_t)


def rotary_pe(x, cos_full, sin_full, *, block_t=None, block_b=None):
    B, T, H, D = x.shape
    assert D % 2 == 0, "head_dim must be even"
    assert cos_full.shape[0] >= T, "rotation table shorter than sequence"
    assert cos_full.shape[1] == D, "rotation table dim must equal head_dim"
    HD = H * D
    itemsize = jnp.dtype(x.dtype).itemsize
    sublane = 8 if itemsize >= 4 else 16

    # Flatten heads into the lane dim (lane-dense 128-wide output).
    x_flat = x.reshape(B, T, HD)

    # Replicate the tables over at most one vreg's worth of heads host-side;
    # the kernel broadcasts the rest in-lane (keeps table HBM traffic tiny).
    rep0 = _head_replication(H, D)
    lane_reps = H // rep0
    W = D * rep0
    cos_t = cos_full[:T].astype(jnp.float32)
    sin_t = sin_full[:T].astype(jnp.float32)
    if rep0 > 1:
        cos_t = jnp.tile(cos_t, (1, rep0))           # (T, W)
        sin_t = jnp.tile(sin_t, (1, rep0))

    # Generation-aware sizing.
    try:
        vmem_cap = int(pltpu.get_tpu_info().vmem_capacity_bytes)
    except Exception:
        vmem_cap = 64 << 20                          # conservative (v7x)
    target_bytes = (8 << 20) if vmem_cap >= (96 << 20) else (4 << 20)

    if block_b is None or block_t is None:
        auto_b, auto_t = _choose_blocks(B, T, HD, itemsize, sublane, target_bytes)
        block_b = auto_b if block_b is None else block_b
        block_t = auto_t if block_t is None else block_t

    grid = (pl.cdiv(B, block_b), pl.cdiv(T, block_t))

    blk_bytes = block_b * block_t * HD * itemsize
    tab_bytes = block_t * W * 4
    # x-in + out double-buffered, cos/sin double-buffered, plus slack.
    need = 4 * blk_bytes + 4 * tab_bytes + (4 << 20)
    vmem_limit = int(min(max(need, 32 << 20), (vmem_cap * 3) // 4))

    cost = pl.CostEstimate(
        flops=4 * B * T * HD,
        transcendentals=0,
        bytes_accessed=2 * B * T * HD * itemsize + 2 * T * W * 4,
    )

    out_flat = pl.pallas_call(
        functools.partial(_rotary_kernel, lane_reps=lane_reps),
        out_shape=jax.ShapeDtypeStruct((B, T, HD), x.dtype),
        grid_spec=pltpu.PrefetchScalarGridSpec(
            num_scalar_prefetch=0,
            grid=grid,
            in_specs=[
                pl.BlockSpec((block_b, block_t, HD), lambda b, t: (b, t, 0)),
                pl.BlockSpec((block_t, W), lambda b, t: (t, 0)),
                pl.BlockSpec((block_t, W), lambda b, t: (t, 0)),
            ],
            out_specs=pl.BlockSpec((block_b, block_t, HD), lambda b, t: (b, t, 0)),
        ),
        compiler_params=pltpu.CompilerParams(
            dimension_semantics=("parallel", "parallel"),
            vmem_limit_bytes=vmem_limit,
        ),
        cost_estimate=cost,
    )(x_flat, cos_t, sin_t)
    return out_flat.reshape(B, T, H, D)


def rotary_ref(x, context_length, dim, freq):
    """Pure-JAX reference matching the PyTorch forward exactly."""
    if dim % 2 != 0:
        dim += 1
    B, T, H, D = x.shape
    power = 2.0 * jnp.arange(0, dim, 2, dtype=jnp.float32) / dim
    inv_freq = 1.0 / (freq ** power)
    m = jnp.arange(context_length, dtype=jnp.float32)
    angles = jnp.outer(m, inv_freq)[:T]                     # (T, dim/2)
    cos = jnp.cos(angles)[None, :, None, :]
    sin = jnp.sin(angles)[None, :, None, :]
    a = x[..., 0::2].astype(jnp.float32)
    b = x[..., 1::2].astype(jnp.float32)
    out_r = a * cos - b * sin
    out_i = a * sin + b * cos
    return jnp.stack([out_r, out_i], axis=-1).reshape(B, T, H, D).astype(x.dtype)


if __name__ == "__main__":
    context_length = 32
    dim = 32          # head_dim
    freq = 10000.0
    B, T, H = 2, 16, 4

    key = jax.random.PRNGKey(0)
    x = jax.random.normal(key, (B, T, H, dim), dtype=jnp.float32)

    cos_full, sin_signed_full = make_rotation_tables(context_length, dim, freq)

    out = jax.block_until_ready(rotary_pe(x, cos_full, sin_signed_full))

    ref = rotary_ref(x, context_length, dim, freq)
    assert out.shape == x.shape and out.dtype == x.dtype
    assert jnp.allclose(out, ref, atol=1e-5, rtol=1e-5), "mismatch vs reference"

    print("KERNEL_OK")
</pallas_src>

<mosaic_0001>
module attributes {stable_mosaic.version = 11 : i64} {
  func.func @_rotary_kernel(%arg0: i32, %arg1: i32, %arg2: memref<2x8x128xf32, #tpu.memory_space<vmem>>, %arg3: memref<8x128xf32, #tpu.memory_space<vmem>>, %arg4: memref<8x128xf32, #tpu.memory_space<vmem>>, %arg5: memref<2x8x128xf32, #tpu.memory_space<vmem>>) attributes {dimension_semantics = [#tpu.dimension_semantics<parallel>, #tpu.dimension_semantics<parallel>], iteration_bounds = array<i64: 1, 2>, scalar_prefetch = 0 : i64, scratch_operands = 0 : i64, tpu.core_type = #tpu.core_type<tc>, window_params = [{transform_indices = @transform_0, window_bounds = array<i64: 2, 8, 128>}, {transform_indices = @transform_1, window_bounds = array<i64: 8, 128>}, {transform_indices = @transform_2, window_bounds = array<i64: 8, 128>}, {transform_indices = @transform_3, window_bounds = array<i64: 2, 8, 128>}]} {
    %c0 = arith.constant 0 : index
    %c0_0 = arith.constant 0 : index
    %c0_1 = arith.constant 0 : index
    %0 = vector.load %arg2[%c0, %c0_0, %c0_1] : memref<2x8x128xf32, #tpu.memory_space<vmem>>, vector<2x8x128xf32>
    %c0_2 = arith.constant 0 : index
    %c0_3 = arith.constant 0 : index
    %1 = vector.load %arg3[%c0_2, %c0_3] : memref<8x128xf32, #tpu.memory_space<vmem>>, vector<8x128xf32>
    %c0_4 = arith.constant 0 : index
    %c0_5 = arith.constant 0 : index
    %2 = vector.load %arg4[%c0_4, %c0_5] : memref<8x128xf32, #tpu.memory_space<vmem>>, vector<8x128xf32>
    %3 = vector.shape_cast %1 : vector<8x128xf32> to vector<1x8x128xf32>
    %4 = vector.shape_cast %2 : vector<8x128xf32> to vector<1x8x128xf32>
    %c127_i32 = arith.constant 127 : i32
    %5 = tpu.dynamic_rotate %0 by %c127_i32 dim 2 : vector<2x8x128xf32>, i32 -> vector<2x8x128xf32>
    %c1_i32 = arith.constant 1 : i32
    %6 = tpu.dynamic_rotate %0 by %c1_i32 dim 2 : vector<2x8x128xf32>, i32 -> vector<2x8x128xf32>
    %7 = tpu.iota {dimensions = array<i32: 2>} : vector<1x1x128xi32>
    %c1_i32_6 = arith.constant 1 : i32
    %8 = vector.broadcast %c1_i32_6 : i32 to vector<1x1x128xi32>
    %9 = arith.andi %7, %8 : vector<1x1x128xi32>
    %c0_i32 = arith.constant 0 : i32
    %10 = vector.broadcast %c0_i32 : i32 to vector<1x1x128xi32>
    %11 = arith.cmpi eq, %9, %10 : vector<1x1x128xi32>
    %12 = vector.shape_cast %11 : vector<1x1x128xi1> to vector<1x1x128xi1>
    %13 = vector.broadcast %12 : vector<1x1x128xi1> to vector<2x8x128xi1>
    %14 = arith.select %13, %5, %6 : vector<2x8x128xi1>, vector<2x8x128xf32>
    %15 = vector.broadcast %3 : vector<1x8x128xf32> to vector<2x8x128xf32>
    %16 = arith.mulf %0, %15 : vector<2x8x128xf32>
    %17 = vector.broadcast %4 : vector<1x8x128xf32> to vector<2x8x128xf32>
    %18 = arith.mulf %14, %17 : vector<2x8x128xf32>
    %19 = arith.addf %16, %18 : vector<2x8x128xf32>
    %c0_7 = arith.constant 0 : index
    %c0_8 = arith.constant 0 : index
    %c0_9 = arith.constant 0 : index
    %20 = vector.load %arg5[%c0_7, %c0_8, %c0_9] : memref<2x8x128xf32, #tpu.memory_space<vmem>>, vector<2x8x128xf32>
    tpu.vector_store %arg5[%c0_7, %c0_8, %c0_9], %19 {strides = array<i32>} : memref<2x8x128xf32, #tpu.memory_space<vmem>>, vector<2x8x128xf32>,
    return
  }
  func.func @transform_0(%arg0: i32, %arg1: i32) -> (i32, i32, i32) {
    %c0_i32 = arith.constant 0 : i32
    %c0_i32_0 = arith.constant 0 : i32
    return %arg0, %arg1, %c0_i32 : i32, i32, i32
  }
  func.func @transform_1(%arg0: i32, %arg1: i32) -> (i32, i32) {
    %c0_i32 = arith.constant 0 : i32
    %c0_i32_0 = arith.constant 0 : i32
    return %arg1, %c0_i32 : i32, i32
  }
  func.func @transform_2(%arg0: i32, %arg1: i32) -> (i32, i32) {
    %c0_i32 = arith.constant 0 : i32
    %c0_i32_0 = arith.constant 0 : i32
    return %arg1, %c0_i32 : i32, i32
  }
  func.func @transform_3(%arg0: i32, %arg1: i32) -> (i32, i32, i32) {
    %c0_i32 = arith.constant 0 : i32
    %c0_i32_0 = arith.constant 0 : i32
    return %arg0, %arg1, %c0_i32 : i32, i32, i32
  }
}

</mosaic_0001>

<bundles_post_ra>
// kernel: tpu_custom_call.1
= control target key start
LH: loop header
LB: loop body
LE: loop exit
PB: predicated region body
PF: predicated region fallthrough
CT: control target
= control target key end

     0   :  { %s1034_s0 = inlined_call_operand.hbm [shape: f32[2,16,128], index: 0, kind: input, shape index: {}]   ;;  %s1035_s1 = inlined_call_operand.hbm [shape: f32[16,128], index: 1, kind: input, shape index: {}]   ;;  %s1036_s2 = inlined_call_operand.hbm [shape: f32[16,128], index: 2, kind: input, shape index: {}]   ;;  %s1037_s3 = inlined_call_operand.hbm [shape: f32[2,16,128], index: 3, kind: output, shape index: {}]  }
   0x1   :  { %1045 = sst [smem:[#allocation16_spill]] %s1034_s0 }
   0x2   :  { %1046 = sst [smem:[#allocation17_spill]] %s1035_s1 }
   0x3   :  { %8 = vsyncpa [#allocation3], 0 }
   0x4   :  { %10 = vsyncpa [#allocation3 + $0x1], 0 }
   0x5   :  { %11 = vsyncpa [#allocation6], 0 }
   0x6   :  { %13 = vsyncpa [#allocation6 + $0x1], 0 }
   0x7   :  { %14 = vsyncpa [#allocation4], 0 }
   0x8   :  { %16 = vsyncpa [#allocation4 + $0x1], 0  ;;  %s761_s12 = smov 0   ;;  %s763_s13 = smov 0  }
   0x9   :  { %s765_s14 = smov 0   ;;  %s767_s15 = smov 0  }
   0xa   :  { %s769_s16 = smov 0   ;;  %s771_s17 = smov 0  }
   0xb LB: > { %1047 = sst [smem:[#allocation12_spill]] %s715_s14  ;;  %s792_s18 = sadd.s32 4294967295, %s727_s17   ;;  %s727_s17 = sphi %s771_s17, %s22_s17   ;;  %s723_s16 = sphi %s769_s16, %s1073_s16   ;;  %s719_s15 = sphi %s767_s15, %s1072_s15   ;;  %s715_s14 = sphi %s765_s14, %s1071_s14   ;;  %s711_s13 = sphi %s763_s13, %s1075_s13   ;;  %s707_s12 = sphi %s761_s12, %s1074_s12  }
   0xc   : > { %1048 = sst [smem:[#allocation13_spill]] %s723_s16  ;;  %s453_s19 = sadd.s32 4294967294, %s727_s17  }
   0xd   : > { %s31_s20 = sadd.s32 1, %s723_s16  ;;  %s43_s21 = sadd.s32 1, %s715_s14 }
   0xe   : > { %p32_p0 = scmp.ge.s32.totalorder %s31_s20, 2  ;;  %p50_p1 = scmp.ne.s32.totalorder %s715_s14, %s711_s13 }
   0xf   : > { %p51_p2 = scmp.eq.s32.totalorder %s727_s17, 0  ;;  %p56_p3 = scmp.ne.s32.totalorder %s711_s13, %s707_s12 }
  0x10   : > { %s1077_s20 = smov (%p32_p0, %s31_s20), 0  ;;  %p57_p5 = scmp.eq.s32.totalorder %s792_s18, 0 }
  0x11   : > { %1049 = sst [smem:[#allocation14_spill]] %s1077_s20  ;;  %p804_p4 = por %p51_p2, %p50_p1 }
  0x12   : > { %s39_s23 = ssub.s32 %s723_s16, %s1077_s20  ;;  %p134_p6 = scmp.eq.s32.totalorder %s792_s18, 1 }
  0x13   : > { %p41_p7 = scmp.eq.s32.totalorder %s39_s23, 0  ;;  %p812_p8 = por %p57_p5, %p56_p3 }
  0x14   : > { %p816_p9 = por %p134_p6, %p50_p1  ;;  %p140_p10 = scmp.eq.s32.totalorder %s453_s19, 1 }
  0x15   : > { %s1051_s24 = scalar_select %p812_p8, 1, 0 }
  0x16   : > { %s1052_s25 = scalar_select %p816_p9, 1, 0 }
  0x17   : > { %s821_s26 = scalar_select %p41_p7, %s715_s14, %s43_s21  }
  0x18   : > { %p823_p11 = por %p140_p10, %p56_p3  ;;  %p493_p13 = scmp.lt.s32.totalorder %s727_s17, 2 }
  0x19   : > { %1053 = sst [smem:[#allocation15_spill]] %s821_s26  ;;  %s830_s28 = sand.u32 1, %s715_s14  }
  0x1a   : > { %s1054_s27 = scalar_select %p823_p11, 1, 0 }
  0x1b   : > { %s456_s29 = sshll.u32 %s830_s28, 4  ;;  %s834_s30 = sshll.u32 %s723_s16, 7 }
  0x1c   : > { %s1055_s0 = sld [smem:[#allocation16_spill]]  ;;  %s164_s7 = scalar_lea.vmem [#allocation2], %s456_s29 }
  0x1d   : > { %s173_s8 = sshll.u32 %s164_s7, 4  ;;  %p846_p0 = pnand %p493_p13, %p804_p4  ;;  %s842_s8 = int_to_ptr.vmem [resolvable:$true] %s173_s8 }
  0x1e   : > { %s183_s10 = sand.u32 1, %s727_s17   ;;  %s1038_s11 = sshll.u32 %s830_s28, 3 }
  0x1f   : > { %s1056_s9 = scalar_select %p846_p0, 1, 0 }
  0x20   : > { %s1057_s1 = sld [smem:[#allocation17_spill]]  ;;  %s187_s29 = scalar_lea.vmem [#allocation5], %s1038_s11 }
  0x21   : > { %s194_s4 = sshll.u32 %s187_s29, 4  ;;  %s863_s22 = scalar_lea.sflag [#allocation6], %s183_s10  ;;  %s860_s4 = int_to_ptr.vmem [resolvable:$true] %s194_s4 }
  0x22   : > { %s840_s6 = scalar_lea.hbm %s1055_s0, %s834_s30  ;;  %p869_p3 = pneg %p846_p0 }
  0x26   : > { %s856_s23 = scalar_lea.hbm %s1057_s1, %s834_s30  ;;  %s556_s29 = scalar_lea.hbm %s1057_s1, 256 }
  0x27   : > { %s551_s5 = scalar_lea.hbm %s856_s23, 128  ;;  %p557_p6 = scmp.lt.u32.totalorder %s856_s23, %s1057_s1 }
  0x28   : > { %p552_p2 = scmp.ne.s32.totalorder %s856_s23, %s551_s5  ;;  %p558_p7 = scmp.lt.u32.totalorder %s556_s29, %s551_s5 }
  0x29   : > { %p560_p13 = scmp.lt.u32.totalorder %s551_s5, %s856_s23 }
  0x2a   : > { %p554_p4 = pnand %p869_p3, %p552_p2  ;;  %p559_p10 = por %p558_p7, %p557_p6 }
  0x2c   : > { %p555_p5 = pneg %p554_p4  ;;  %p561_p12 = por %p560_p13, %p559_p10 }
  0x2e   : > { %p562_p1 = pnand %p561_p12, %p555_p5 }
  0x30   : > { %565 = shalt.err (!%p562_p1)
}
  0x31   : > { %s566_s10 = scalar_lea.vmem %s860_s4, 128  ;;  %s729_s19 = smov [#allocation5]  }
  0x32   : > { %p567_p2 = scmp.ne.s32.totalorder %s860_s4, %s566_s10  ;;  %s571_s21 = sshll.u32 %s729_s19, 4  ;;  %s572_s21 = int_to_ptr.vmem [resolvable:$false] %s571_s21 }
  0x33   : > { %s573_s20 = scalar_lea.vmem %s572_s21, 256  ;;  %p574_p9 = scmp.lt.s32.totalorder %s860_s4, %s572_s21 }
  0x34   : > { %p569_p4 = pnand %p567_p2, %p869_p3  ;;  %p575_p8 = scmp.lt.s32.totalorder %s573_s20, %s566_s10 }
  0x36   : > { %p570_p11 = pneg %p569_p4  ;;  %p576_p6 = por %p575_p8, %p574_p9 }
  0x38   : > { %p577_p7 = pnand %p576_p6, %p570_p11 }
  0x3a   : > { %580 = shalt.err (!%p577_p7)
}
  0x3b   : > { %485 = dma.hbm_to_vmem [thread:$0]  (!%p846_p0), %s856_s23, 128, %s860_s4, %s863_s22  }
  0x3c   : > { %p217_p12 = scmp.lt.s32.totalorder %s727_s17, 3  ;;  %p1059_p1 = scmp.ge.s32.totalorder %s727_s17, 1 }
  0x3d   : > { %s904_s10 = scalar_lea.hbm %s1036_s2, %s834_s30  ;;  %s161_s19 = scalar_lea.sflag [#allocation3], %s830_s28 }
  0x3e   : > { %p896_p8 = pnand %p1059_p1, %p217_p12  ;;  %s581_s21 = scalar_lea.hbm %s840_s6, 256 }
  0x3f   : > { %p582_p9 = scmp.ne.s32.totalorder %s840_s6, %s581_s21  ;;  %s586_s23 = scalar_lea.hbm %s1055_s0, 512 }
  0x40   : > { %s1060_s11 = scalar_select %p896_p8, 1, 0 }
  0x41   : > { %p584_p11 = pnand %p582_p9, %p869_p3  ;;  %p587_p10 = scmp.lt.u32.totalorder %s840_s6, %s1055_s0 }
  0x42   : > { %p588_p13 = scmp.lt.u32.totalorder %s586_s23, %s581_s21  ;;  %p590_p4 = scmp.lt.u32.totalorder %s581_s21, %s840_s6 }
  0x43   : > { %p585_p5 = pneg %p584_p11 }
  0x44   : > { %p589_p2 = por %p588_p13, %p587_p10 }
  0x46   : > { %p591_p6 = por %p590_p4, %p589_p2 }
  0x48   : > { %p592_p7 = pnand %p591_p6, %p585_p5 }
  0x4a   : > { %595 = shalt.err (!%p592_p7)
}
  0x4b   : > { %s596_s30 = scalar_lea.vmem %s842_s8, 256  ;;  %s730_s1 = smov [#allocation2]  }
  0x4c   : > { %p597_p12 = scmp.ne.s32.totalorder %s842_s8, %s596_s30  ;;  %s601_s5 = sshll.u32 %s730_s1, 4  ;;  %s602_s5 = int_to_ptr.vmem [resolvable:$false] %s601_s5 }
  0x4d   : > { %s603_s16 = scalar_lea.vmem %s602_s5, 512  ;;  %p604_p11 = scmp.lt.s32.totalorder %s842_s8, %s602_s5 }
  0x4e   : > { %p599_p1 = pnand %p597_p12, %p869_p3  ;;  %p605_p8 = scmp.lt.s32.totalorder %s603_s16, %s596_s30 }
  0x50   : > { %p600_p9 = pneg %p599_p1  ;;  %p606_p10 = por %p605_p8, %p604_p11 }
  0x52   : > { %p607_p13 = pnand %p606_p10, %p600_p9 }
  0x54   : > { %610 = shalt.err (!%p607_p13)
}
  0x55   : > { %s731_s29 = smov 256   ;;  %s732_s21 = smov 128  }
  0x56   : > { %s733_s20 = smov 8   ;;  %s1061_s23 = sshll.u32 %s830_s28, 3 }
  0x57   : > { %482 = dma.hbm_to_vmem [thread:$0]  (!%p846_p0), %s840_s6, 256, %s842_s8, %s161_s19, %s731_s29, %s732_s21, %s733_s20  }
  0x58   : > { %s205_s4 = scalar_lea.vmem [#allocation7], %s1061_s23  ;;  %s611_s1 = scalar_lea.hbm %s904_s10, 128 }
  0x59   : > { %s212_s30 = sshll.u32 %s205_s4, 4  ;;  %p612_p8 = scmp.ne.s32.totalorder %s904_s10, %s611_s1  ;;  %s213_s30 = int_to_ptr.vmem [resolvable:$true] %s212_s30 }
  0x5a   : > { %s616_s0 = scalar_lea.hbm %s1036_s2, 256  ;;  %p617_p4 = scmp.lt.u32.totalorder %s904_s10, %s1036_s2 }
  0x5b   : > { %p614_p5 = pnand %p612_p8, %p869_p3  ;;  %p618_p6 = scmp.lt.u32.totalorder %s616_s0, %s611_s1 }
  0x5c   : > { %p620_p12 = scmp.lt.u32.totalorder %s611_s1, %s904_s10 }
  0x5d   : > { %p615_p2 = pneg %p614_p5  ;;  %p619_p7 = por %p618_p6, %p617_p4 }
  0x5f   : > { %p621_p1 = por %p620_p12, %p619_p7 }
  0x61   : > { %p622_p9 = pnand %p621_p1, %p615_p2 }
  0x63   : > { %625 = shalt.err (!%p622_p9)
}
  0x64   : > { %s626_s28 = scalar_lea.vmem %s213_s30, 128  ;;  %s734_s6 = smov [#allocation7]  }
  0x65   : > { %p627_p11 = scmp.ne.s32.totalorder %s213_s30, %s626_s28  ;;  %s631_s8 = sshll.u32 %s734_s6, 4  ;;  %s632_s8 = int_to_ptr.vmem [resolvable:$false] %s631_s8 }
  0x66   : > { %s633_s19 = scalar_lea.vmem %s632_s8, 256  ;;  %p634_p8 = scmp.lt.s32.totalorder %s213_s30, %s632_s8 }
  0x67   : > { %p629_p10 = pnand %p627_p11, %p869_p3  ;;  %p635_p5 = scmp.lt.s32.totalorder %s633_s19, %s626_s28 }
  0x69   : > { %p630_p13 = pneg %p629_p10  ;;  %p636_p0 = por %p635_p5, %p634_p8 }
  0x6b   : > { %p637_p4 = pnand %p636_p0, %p630_p13 }
  0x6d   : > { %640 = shalt.err (!%p637_p4)
}
  0x6e   : > { %p1062_p6 = scmp.ne.s32.totalorder %s1056_s9, 0  ;;  %p1063_p2 = scmp.ne.s32.totalorder %s1060_s11, 0 }
  0x6f   : > { %s953_s0 = sand.u32 (!%p1063_p2), 1, %s711_s13   ;;  %p1064_p0 = scmp.ne.s32.totalorder (!%p1063_p2), %s1051_s24, 0 }
  0x70   : > { %488 = dma.hbm_to_vmem [thread:$0]  (!%p1062_p6), %s904_s10, 128, %s213_s30, %s863_s22  }
  0x71   : > { %221 = sbr.rel (%p1063_p2) target bundleno = 265 (0x109), region = 32  ;;  %s463_s14 = sshll.u32 (!%p1063_p2), %s953_s0, 4 }
  0x72   : > { %s224_s26 = scalar_lea.sflag (!%p1063_p2), [#allocation3], %s953_s0  ;;  %s227_s7 = scalar_lea.vmem (!%p1063_p2), [#allocation2], %s463_s14 }
  0x78   : > { %694 = dma.done.wait (%p1064_p0), %s224_s26, 256  }
  0x79   : > { %696 = vsyncadd (%p1064_p0), %s224_s26, 4294967040  ;;  %s232_s9 = sand.u32 1, %s792_s18   ;;  %s464_s22 = sshll.u32 %s953_s0, 3 }
  0x7a   : > { %s233_s11 = scalar_lea.sflag [#allocation6], %s232_s9  ;;  %s236_s10 = scalar_lea.vmem [#allocation5], %s464_s22 }
  0x7b   : > { %698 = dma.done.wait (%p1064_p0), %s233_s11, 256  }
  0x7c   : > { %700 = vsyncadd (%p1064_p0), %s233_s11, 4294967040  ;;  %v280_v0 = vld [vmem:[%s227_s7] sm:$0xff]  ;;  %s735_s29 = smov 1   ;;  %s736_s21 = smov 127   ;;  %v281_v1 = vld [vmem:[%s227_s7 + $0x8] sm:$0xff]  ;;  %v292_v2 = vlaneseq }
  0x7d   : > { %288 = vrot.lane.b32.xlu1 %v280_v0, %s735_s29  ;;  %284 = vrot.lane.b32.xlu0 %v280_v0, %s736_s21  ;;  %v282_v5 = vld [vmem:[%s236_s10] sm:$0xff]  ;;  %s245_s18 = scalar_lea.vmem [#allocation7], %s464_s22  ;;  %s277_s24 = scalar_lea.vmem [#allocation8], %s463_s14 }
  0x7e   : > { %v293_v3 = vand.u32 127, %v292_v2  ;;  %v283_v7 = vld [vmem:[%s245_s18] sm:$0xff]  ;;  %v300_v8 = vmul.f32 %v282_v5, %v280_v0  ;;  %s324_s20 = sshll.u32 %s277_s24, 4  ;;  %v301_v13 = vmul.f32 %v282_v5, %v281_v1  ;;  %s468_s23 = sshll.u32 %s719_s15, 7  ;;  %s980_s20 = int_to_ptr.vmem [resolvable:$true] %s324_s20 }
  0x7f   : > { %s985_s1 = scalar_lea.hbm %s1037_s3, %s468_s23  ;;  %s309_s5 = scalar_lea.sflag [#allocation4], %s953_s0 }
  0x80   : > { %v294_v4 = vand.u32 1, %v293_v3  ;;  %s641_s16 = scalar_lea.vmem %s980_s20, 256  ;;  %p1067_p7 = scmp.ne.s32.totalorder %s1052_s25, 0 }
  0x81   : > { %290 = vrot.lane.b32.xlu1 %v281_v1, %s735_s29  ;;  %286 = vrot.lane.b32.xlu0 %v281_v1, %s736_s21  ;;  %p642_p3 = scmp.ne.s32.totalorder %s980_s20, %s641_s16  ;;  %s737_s15 = smov [#allocation8]  }
  0x82   : > { %vm969_vm0 = vcmp.eq.s32.totalorder %v294_v4, 0  ;;  %s645_s28 = sshll.u32 %s737_s15, 4  ;;  %s646_s28 = int_to_ptr.vmem [resolvable:$false] %s645_s28 }
  0x83   : > { %p643_p12 = pnand %p642_p3, %p1067_p7  ;;  %s647_s6 = scalar_lea.vmem %s646_s28, 512 }
  0x84   : > { %p648_p9 = scmp.lt.s32.totalorder %s980_s20, %s646_s28  ;;  %p649_p11 = scmp.lt.s32.totalorder %s647_s6, %s641_s16 }
  0x85   : > { %p644_p1 = pneg %p643_p12 }
  0x86   : > { %p650_p10 = por %p649_p11, %p648_p9 }
  0x88   : > { %p651_p13 = pnand %p650_p10, %p644_p1 }
  0xef   : > { %v289_v9 = vpop.permute.xlu1 %288  ;;  %v285_v10 = vpop.permute.xlu0 %284 }
  0xf0   : > { %v298_v11 = vsel %vm969_vm0, %v285_v10, %v289_v9 }
  0xf1   : > { %v302_v12 = vmul.f32 %v298_v11, %v283_v7 }
  0xf3   : > { %v304_v14 = vadd.f32 %v302_v12, %v300_v8  ;;  %v291_v15 = vpop.permute.xlu1 %290  ;;  %v287_v16 = vpop.permute.xlu0 %286 }
  0xf4   : > { %v299_v17 = vsel %vm969_vm0, %v287_v16, %v291_v15 }
  0xf5   : > { %306 = vst [vmem:[%s277_s24] sm:$0xff] %v304_v14  ;;  %v303_v18 = vmul.f32 %v299_v17, %v283_v7 }
  0xf7   : > { %v305_v19 = vadd.f32 %v303_v18, %v301_v13 }
  0xf9   : > { %307 = vst [vmem:[%s277_s24 + $0x8] sm:$0xff] %v305_v19 }
  0xfa   : > { %654 = shalt.err (!%p651_p13)
}
  0xfb   : > { %s655_s8 = scalar_lea.hbm %s985_s1, 256  ;;  %s659_s26 = scalar_lea.hbm %s1037_s3, 512 }
  0xfc   : > { %p656_p8 = scmp.ne.s32.totalorder %s985_s1, %s655_s8  ;;  %p660_p6 = scmp.lt.u32.totalorder %s985_s1, %s1037_s3 }
  0xfd   : > { %p661_p2 = scmp.lt.u32.totalorder %s659_s26, %s655_s8  ;;  %p663_p3 = scmp.lt.u32.totalorder %s655_s8, %s985_s1 }
  0xfe   : > { %p657_p5 = pnand %p656_p8, %p1067_p7 }
  0xff   : > { %p662_p0 = por %p661_p2, %p660_p6 }
 0x100   : > { %p658_p4 = pneg %p657_p5 }
 0x101   : > { %p664_p12 = por %p663_p3, %p662_p0 }
 0x103   : > { %p665_p1 = pnand %p664_p12, %p658_p4 }
 0x105   : > { %668 = shalt.err (!%p665_p1)
}
 0x106   : > { %s738_s22 = smov 128   ;;  %s739_s11 = smov 256  }
 0x107   : > { %s740_s10 = smov 8  }
 0x108   : > { %477 = dma.vmem_to_hbm [thread:$0]  (%p1067_p7), %s980_s20, 256, %s985_s1, %s309_s5, %s738_s22, %s739_s11, %s740_s10  }
 0x109 PF: > { %s339_s29 = sand.u32 1, %s707_s12   ;;  %p1068_p9 = scmp.ne.s32.totalorder %s1054_s27, 0 }
 0x10a   : > { %p1069_p11 = scmp.ge.s32.totalorder %s727_s17, 2  ;;  %s340_s21 = scalar_lea.sflag [#allocation4], %s339_s29 }
 0x10c   : > { %p490_p10 = pnand %p1069_p11, %p1068_p9 }
 0x10e   : > { %702 = dma.done.wait (!%p490_p10), %s340_s21, 256  }
 0x10f   : > { %704 = vsyncadd (!%p490_p10), %s340_s21, 4294967040  ;;  %s22_s17 = sadd.s32 1, %s727_s17   ;;  %s1070_s18 = sld [smem:[#allocation12_spill]] }
 0x110   : > { %p19_p13 = scmp.ge.s32.totalorder %s22_s17, 4   ;;  %s1071_s14 = sld [smem:[#allocation15_spill]] }
 0x111   : > { %s1072_s15 = sld [smem:[#allocation13_spill]]  ;;  %s1073_s16 = sld [smem:[#allocation14_spill]] }
 0x112   : > { %s1074_s12 = smov %s711_s13  ;;  %21 = sbr.rel (!%p19_p13) target bundleno = 11 (0xb), region = 101 }
 0x115   : > { %s1075_s13 = smov %s1070_s18 }
 0x119   :  { %345 = vsyncpa [#allocation3], 1 }
 0x11a   :  { %347 = vsyncpa [#allocation3 + $0x1], 1 }
 0x11b   :  { %348 = vsyncpa [#allocation6], 1 }
 0x11c   :  { %350 = vsyncpa [#allocation6 + $0x1], 1 }
 0x11d   :  { %351 = vsyncpa [#allocation4], 1 }
 0x11e   :  { %353 = vsyncpa [#allocation4 + $0x1], 1 }

</bundles_post_ra>
